<compile_context>
chip_gen: v6e
topology: v6e:2x2x1
jax: 0.10.0
libtpu: 0.0.40
codegen_flags: <defaults>
</compile_context>

<pallas_src>
import jax
import jax.numpy as jnp
from jax import lax
from jax.experimental import pallas as pl
from jax.experimental.pallas import tpu as pltpu


def _round_up(v, m):
    return (v + m - 1) // m * m


def _cdiv(a, b):
    return -(-a // b)


def _vmem_capacity_bytes():
    """Per-core VMEM capacity; conservative fallback if the query fails."""
    try:
        cap = int(pltpu.get_tpu_info().vmem_capacity_bytes)
        return max(32 << 20, min(cap, 128 << 20))
    except Exception:
        return 64 << 20   # conservative: v7x physical VMEM


def _pick_feature_tile(f):
    if f <= 128:
        # Single full-extent feature block: no feature padding, no partial block.
        return f
    # >= 2 feature tiles whenever possible so the "parallel" feature axis gives
    # both v7x TensorCores work; keep tiles in [128, 512] (lane-dense, few steps).
    fp0 = _round_up(f, 128)
    half = _round_up((fp0 + 1) // 2, 128)
    return max(128, min(512, half))


def adaptive_relu_forward(x, t, scalars, *, target_block_bytes=4 << 20):
    """AdaptiveReLU forward.

    x:       [N, F] float32  (single multiset; the PyTorch module uses batch_idx == 0)
    t:       [F]    float32  learned interpolation between per-feature max and min
    scalars: [4, F] float32  projection of [n, min, max, relu_sum]

    Returns [N + 1, F] (row 0 = multiset summary; rows 1.. are the zero rows the
    zero-initialized scatter targets produce in the PyTorch code), last dim
    squeezed if F == 1 (mirrors `.squeeze(-1)`).
    """
    n, f = x.shape
    assert n >= 1
    assert t.shape == (f,)
    assert scalars.shape == (4, f)

    if x.dtype != jnp.float32:
        x = x.astype(jnp.float32)

    # ---- feature tiling ------------------------------------------------------
    tf = _pick_feature_tile(f)
    n_ftiles = _cdiv(f, tf)
    fp = n_ftiles * tf
    # Only the tiny parameter tensors get feature-padded; x streams unpadded.
    tp = jnp.pad(t.astype(jnp.float32).reshape(1, f), ((0, 0), (0, fp - f)))
    sp = jnp.pad(scalars.astype(jnp.float32), ((0, 0), (0, fp - f)))

    # ---- instance tiling (large blocks amortize per-step overhead) ------------
    tf_lanes = _round_up(tf, 128)                       # physical lane width
    tile_n = max(8, target_block_bytes // (tf_lanes * 4))
    tile_n = _round_up(min(tile_n, _round_up(n, 8)), 8)
    nt = _cdiv(n, tile_n)
    n_pad = nt * tile_n
    needs_mask = n_pad != n
    groups = (tile_n // 8, 8, tf)                       # sublane-group view

    # ---- VMEM budget / resident-slab decision ---------------------------------
    block_bytes = tile_n * tf_lanes * 4
    slab_bytes = n_pad * tf_lanes * 4
    cap = _vmem_capacity_bytes()
    resident_need = slab_bytes + 2 * block_bytes + (4 << 20)
    resident = resident_need <= cap - (16 << 20)
    need = resident_need if resident else (2 * block_bytes + (4 << 20))
    vmem_limit = int(max(need, 32 << 20))

    # =================== path 1: x cached in a VMEM-resident slab =============
    def resident_kernel(x_ref, t_ref, s_ref, o_ref, xslab, mn_sc, mx_sc):
        i = pl.program_id(1)

        @pl.when(i == 0)
        def _init():
            mn_sc[...] = jnp.full(mn_sc.shape, jnp.inf, dtype=mn_sc.dtype)
            mx_sc[...] = jnp.full(mx_sc.shape, -jnp.inf, dtype=mx_sc.dtype)

        xv = x_ref[...]                                  # (tile_n, tf) f32
        if needs_mask:
            row = i * tile_n + lax.broadcasted_iota(jnp.int32, (tile_n, 1), 0)
            valid = row < n
            x_lo = jnp.where(valid, xv, jnp.inf)         # padded rows -> +inf (min)
            x_hi = jnp.where(valid, xv, -jnp.inf)        # padded rows -> -inf (max / relu 0)
        else:
            x_lo = xv
            x_hi = xv

        # Running min/max reduced only over sublane groups (pure VPU adds);
        # the 8 -> 1 cross-sublane reduce is deferred to the epilogue.
        mn_sc[...] = jnp.minimum(mn_sc[...], x_lo.reshape(groups).min(axis=0))
        mx_sc[...] = jnp.maximum(mx_sc[...], x_hi.reshape(groups).max(axis=0))

        if nt > 1:
            # Cache this block (x is only read from HBM once).
            xslab[i] = x_hi

        @pl.when(i == nt - 1)
        def _epilogue():
            mn = jnp.min(mn_sc[...], axis=0, keepdims=True)     # (1, tf)
            mx = jnp.max(mx_sc[...], axis=0, keepdims=True)
            tv = t_ref[...]                                     # (1, tf)
            bias = tv * mx + (1.0 - tv) * mn

            if nt == 1:
                acc = jnp.maximum(x_hi - bias, 0.0).reshape(groups).sum(axis=0)
            else:
                def body(c, a):
                    blk = xslab[c]                              # (tile_n, tf)
                    r = jnp.maximum(blk - bias, 0.0)            # -inf rows -> 0
                    return a + r.reshape(groups).sum(axis=0)
                acc = lax.fori_loop(0, nt, body, jnp.zeros((8, tf), jnp.float32))

            rsum = jnp.sum(acc, axis=0, keepdims=True)          # (1, tf)
            sv = s_ref[...]                                     # (4, tf)
            o_ref[...] = (sv[0:1, :] * jnp.float32(n)
                          + sv[1:2, :] * mn
                          + sv[2:3, :] * mx
                          + sv[3:4, :] * rsum)

    # =================== path 2: streaming two-pass fallback ===================
    def streaming_kernel(x_ref, t_ref, s_ref, o_ref, mn_sc, mx_sc, acc_sc, bias_sc):
        p = pl.program_id(1)               # 0: min/max pass, 1: relu-sum pass
        i = pl.program_id(2)               # instance tile

        @pl.when((p == 0) & (i == 0))
        def _init():
            mn_sc[...] = jnp.full(mn_sc.shape, jnp.inf, dtype=mn_sc.dtype)
            mx_sc[...] = jnp.full(mx_sc.shape, -jnp.inf, dtype=mx_sc.dtype)
            acc_sc[...] = jnp.zeros(acc_sc.shape, dtype=acc_sc.dtype)

        xv = x_ref[...]
        if needs_mask:
            row = i * tile_n + lax.broadcasted_iota(jnp.int32, (tile_n, 1), 0)
            valid = row < n
        else:
            valid = None

        @pl.when(p == 0)
        def _minmax():
            x_lo = xv if valid is None else jnp.where(valid, xv, jnp.inf)
            x_hi = xv if valid is None else jnp.where(valid, xv, -jnp.inf)
            mn_sc[...] = jnp.minimum(mn_sc[...], x_lo.reshape(groups).min(axis=0))
            mx_sc[...] = jnp.maximum(mx_sc[...], x_hi.reshape(groups).max(axis=0))

        @pl.when((p == 1) & (i == 0))
        def _bias_once():
            mn = jnp.min(mn_sc[...], axis=0, keepdims=True)
            mx = jnp.max(mx_sc[...], axis=0, keepdims=True)
            tv = t_ref[...]
            bias_sc[...] = tv * mx + (1.0 - tv) * mn

        @pl.when(p == 1)
        def _relu_sum():
            r = jnp.maximum(xv - bias_sc[...], 0.0)
            if valid is not None:
                r = jnp.where(valid, r, 0.0)
            acc_sc[...] += r.reshape(groups).sum(axis=0)

        @pl.when((p == 1) & (i == nt - 1))
        def _epilogue():
            mn = jnp.min(mn_sc[...], axis=0, keepdims=True)
            mx = jnp.max(mx_sc[...], axis=0, keepdims=True)
            rsum = jnp.sum(acc_sc[...], axis=0, keepdims=True)
            sv = s_ref[...]
            o_ref[...] = (sv[0:1, :] * jnp.float32(n)
                          + sv[1:2, :] * mn
                          + sv[2:3, :] * mx
                          + sv[3:4, :] * rsum)

    if resident:
        out_padded = pl.pallas_call(
            resident_kernel,
            out_shape=jax.ShapeDtypeStruct((1, fp), jnp.float32),
            grid_spec=pltpu.PrefetchScalarGridSpec(
                num_scalar_prefetch=0,
                grid=(n_ftiles, nt),
                in_specs=[
                    pl.BlockSpec((tile_n, tf), lambda fi, i: (i, fi)),
                    pl.BlockSpec((1, tf), lambda fi, i: (0, fi)),
                    pl.BlockSpec((4, tf), lambda fi, i: (0, fi)),
                ],
                out_specs=pl.BlockSpec((1, tf), lambda fi, i: (0, fi)),
                scratch_shapes=[
                    pltpu.VMEM((nt, tile_n, tf), jnp.float32),  # resident x slab
                    pltpu.VMEM((8, tf), jnp.float32),           # running min
                    pltpu.VMEM((8, tf), jnp.float32),           # running max
                ],
            ),
            compiler_params=pltpu.CompilerParams(
                dimension_semantics=("parallel", "arbitrary"),
                vmem_limit_bytes=vmem_limit,
            ),
        )(x, tp, sp)
    else:
        out_padded = pl.pallas_call(
            streaming_kernel,
            out_shape=jax.ShapeDtypeStruct((1, fp), jnp.float32),
            grid_spec=pltpu.PrefetchScalarGridSpec(
                num_scalar_prefetch=0,
                grid=(n_ftiles, 2, nt),
                in_specs=[
                    pl.BlockSpec((tile_n, tf), lambda fi, p, i: (i, fi)),
                    pl.BlockSpec((1, tf), lambda fi, p, i: (0, fi)),
                    pl.BlockSpec((4, tf), lambda fi, p, i: (0, fi)),
                ],
                out_specs=pl.BlockSpec((1, tf), lambda fi, p, i: (0, fi)),
                scratch_shapes=[
                    pltpu.VMEM((8, tf), jnp.float32),   # running min
                    pltpu.VMEM((8, tf), jnp.float32),   # running max
                    pltpu.VMEM((8, tf), jnp.float32),   # running relu-sum
                    pltpu.VMEM((1, tf), jnp.float32),   # hoisted bias
                ],
            ),
            compiler_params=pltpu.CompilerParams(
                dimension_semantics=("parallel", "arbitrary", "arbitrary"),
                vmem_limit_bytes=vmem_limit,
            ),
        )(x, tp, sp)

    # The PyTorch module scatters into (N + 1, F) zero-initialized targets; only
    # row 0 (batch_idx == 0) is non-trivial.  Build the result with one fused
    # concatenate instead of zeros + scatter.
    row0 = out_padded[0, :f]
    out = jnp.concatenate([row0[None, :], jnp.zeros((n, f), jnp.float32)], axis=0)
    if f == 1:
        out = out.squeeze(-1)
    return out


if __name__ == "__main__":
    key = jax.random.PRNGKey(0)
    k_x, k_s, k_t = jax.random.split(key, 3)

    num_instances = 16
    feature_dim = 32

    x = jax.random.normal(k_x, (num_instances, feature_dim), dtype=jnp.float32)
    scalars = jax.random.normal(k_s, (4, feature_dim), dtype=jnp.float32)
    t = jax.random.uniform(k_t, (feature_dim,), dtype=jnp.float32,
                           minval=0.0, maxval=1.0)

    out = adaptive_relu_forward(x, t, scalars)
    out = jax.block_until_ready(out)

    # Pure-JAX reference (same math as the PyTorch forward with batch_idx == 0).
    mn = jnp.min(x, axis=0)
    mx = jnp.max(x, axis=0)
    bias = t * mx + (1.0 - t) * mn
    rsum = jnp.sum(jnp.maximum(x - bias, 0.0), axis=0)
    row0 = (scalars[0] * num_instances + scalars[1] * mn
            + scalars[2] * mx + scalars[3] * rsum)
    ref = jnp.zeros((num_instances + 1, feature_dim), jnp.float32).at[0].set(row0)

    assert out.shape == ref.shape
    assert jnp.allclose(out, ref, atol=1e-5, rtol=1e-5)

    print("KERNEL_OK")
</pallas_src>

<mosaic_0001>
module attributes {stable_mosaic.version = 11 : i64} {
  func.func @resident_kernel(%arg0: i32, %arg1: i32, %arg2: memref<16x32xf32, #tpu.memory_space<vmem>>, %arg3: memref<1x32xf32, #tpu.memory_space<vmem>>, %arg4: memref<4x32xf32, #tpu.memory_space<vmem>>, %arg5: memref<1x32xf32, #tpu.memory_space<vmem>>, %arg6: memref<1x16x32xf32, #tpu.memory_space<vmem>>, %arg7: memref<8x32xf32, #tpu.memory_space<vmem>>, %arg8: memref<8x32xf32, #tpu.memory_space<vmem>>) attributes {dimension_semantics = [#tpu.dimension_semantics<parallel>, #tpu.dimension_semantics<arbitrary>], iteration_bounds = array<i64: 1, 1>, scalar_prefetch = 0 : i64, scratch_operands = 3 : i64, tpu.core_type = #tpu.core_type<tc>, window_params = [{transform_indices = @transform_0, window_bounds = array<i64: 16, 32>}, {transform_indices = @transform_1, window_bounds = array<i64: 1, 32>}, {transform_indices = @transform_2, window_bounds = array<i64: 4, 32>}, {transform_indices = @transform_3, window_bounds = array<i64: 1, 32>}]} {
    %c0_i32 = arith.constant 0 : i32
    %0 = arith.cmpi eq, %arg1, %c0_i32 : i32
    %1 = arith.extui %0 : i1 to i32
    %c0_i32_0 = arith.constant 0 : i32
    %2 = arith.cmpi ne, %1, %c0_i32_0 : i32
    scf.if %2 {
      %cst_13 = arith.constant 0x7F800000 : f32
      %17 = vector.broadcast %cst_13 : f32 to vector<8x32xf32>
      %c0_14 = arith.constant 0 : index
      %c0_15 = arith.constant 0 : index
      %18 = vector.load %arg7[%c0_14, %c0_15] : memref<8x32xf32, #tpu.memory_space<vmem>>, vector<8x32xf32>
      tpu.vector_store %arg7[%c0_14, %c0_15], %17 {strides = array<i32>} : memref<8x32xf32, #tpu.memory_space<vmem>>, vector<8x32xf32>,
      %cst_16 = arith.constant 0xFF800000 : f32
      %19 = vector.broadcast %cst_16 : f32 to vector<8x32xf32>
      %c0_17 = arith.constant 0 : index
      %c0_18 = arith.constant 0 : index
      %20 = vector.load %arg8[%c0_17, %c0_18] : memref<8x32xf32, #tpu.memory_space<vmem>>, vector<8x32xf32>
      tpu.vector_store %arg8[%c0_17, %c0_18], %19 {strides = array<i32>} : memref<8x32xf32, #tpu.memory_space<vmem>>, vector<8x32xf32>,
    } else {
    }
    %c0 = arith.constant 0 : index
    %c0_1 = arith.constant 0 : index
    %3 = vector.load %arg2[%c0, %c0_1] : memref<16x32xf32, #tpu.memory_space<vmem>>, vector<16x32xf32>
    %c0_2 = arith.constant 0 : index
    %c0_3 = arith.constant 0 : index
    %4 = vector.load %arg7[%c0_2, %c0_3] : memref<8x32xf32, #tpu.memory_space<vmem>>, vector<8x32xf32>
    %5 = vector.shape_cast %3 : vector<16x32xf32> to vector<2x8x32xf32>
    %cst = arith.constant dense<0x7F800000> : vector<8x32xf32>
    %6 = vector.multi_reduction <minimumf>, %5, %cst [0] : vector<2x8x32xf32> to vector<8x32xf32>
    %7 = arith.minimumf %4, %6 : vector<8x32xf32>
    %c0_4 = arith.constant 0 : index
    %c0_5 = arith.constant 0 : index
    %8 = vector.load %arg7[%c0_4, %c0_5] : memref<8x32xf32, #tpu.memory_space<vmem>>, vector<8x32xf32>
    tpu.vector_store %arg7[%c0_4, %c0_5], %7 {strides = array<i32>} : memref<8x32xf32, #tpu.memory_space<vmem>>, vector<8x32xf32>,
    %c0_6 = arith.constant 0 : index
    %c0_7 = arith.constant 0 : index
    %9 = vector.load %arg8[%c0_6, %c0_7] : memref<8x32xf32, #tpu.memory_space<vmem>>, vector<8x32xf32>
    %10 = vector.shape_cast %3 : vector<16x32xf32> to vector<2x8x32xf32>
    %cst_8 = arith.constant dense<0xFF800000> : vector<8x32xf32>
    %11 = vector.multi_reduction <maximumf>, %10, %cst_8 [0] : vector<2x8x32xf32> to vector<8x32xf32>
    %12 = arith.maximumf %9, %11 : vector<8x32xf32>
    %c0_9 = arith.constant 0 : index
    %c0_10 = arith.constant 0 : index
    %13 = vector.load %arg8[%c0_9, %c0_10] : memref<8x32xf32, #tpu.memory_space<vmem>>, vector<8x32xf32>
    tpu.vector_store %arg8[%c0_9, %c0_10], %12 {strides = array<i32>} : memref<8x32xf32, #tpu.memory_space<vmem>>, vector<8x32xf32>,
    %c0_i32_11 = arith.constant 0 : i32
    %14 = arith.cmpi eq, %arg1, %c0_i32_11 : i32
    %15 = arith.extui %14 : i1 to i32
    %c0_i32_12 = arith.constant 0 : i32
    %16 = arith.cmpi ne, %15, %c0_i32_12 : i32
    scf.if %16 {
      %c0_13 = arith.constant 0 : index
      %c0_14 = arith.constant 0 : index
      %17 = vector.load %arg7[%c0_13, %c0_14] : memref<8x32xf32, #tpu.memory_space<vmem>>, vector<8x32xf32>
      %cst_15 = arith.constant dense<0x7F800000> : vector<32xf32>
      %18 = vector.multi_reduction <minimumf>, %17, %cst_15 [0] : vector<8x32xf32> to vector<32xf32>
      %19 = vector.shape_cast %18 : vector<32xf32> to vector<1x32xf32>
      %c0_16 = arith.constant 0 : index
      %c0_17 = arith.constant 0 : index
      %20 = vector.load %arg8[%c0_16, %c0_17] : memref<8x32xf32, #tpu.memory_space<vmem>>, vector<8x32xf32>
      %cst_18 = arith.constant dense<0xFF800000> : vector<32xf32>
      %21 = vector.multi_reduction <maximumf>, %20, %cst_18 [0] : vector<8x32xf32> to vector<32xf32>
      %22 = vector.shape_cast %21 : vector<32xf32> to vector<1x32xf32>
      %c0_19 = arith.constant 0 : index
      %c0_20 = arith.constant 0 : index
      %23 = vector.load %arg3[%c0_19, %c0_20] : memref<1x32xf32, #tpu.memory_space<vmem>>, vector<1x32xf32>
      %24 = arith.mulf %23, %22 : vector<1x32xf32>
      %cst_21 = arith.constant 1.000000e+00 : f32
      %25 = vector.broadcast %cst_21 : f32 to vector<1x32xf32>
      %26 = arith.subf %25, %23 : vector<1x32xf32>
      %27 = arith.mulf %26, %19 : vector<1x32xf32>
      %28 = arith.addf %24, %27 : vector<1x32xf32>
      %29 = vector.broadcast %28 : vector<1x32xf32> to vector<16x32xf32>
      %30 = arith.subf %3, %29 : vector<16x32xf32>
      %cst_22 = arith.constant 0.000000e+00 : f32
      %31 = vector.broadcast %cst_22 : f32 to vector<16x32xf32>
      %32 = arith.maximumf %30, %31 : vector<16x32xf32>
      %33 = vector.shape_cast %32 : vector<16x32xf32> to vector<2x8x32xf32>
      %cst_23 = arith.constant dense<0.000000e+00> : vector<8x32xf32>
      %34 = vector.multi_reduction <add>, %33, %cst_23 [0] : vector<2x8x32xf32> to vector<8x32xf32>
      %cst_24 = arith.constant dense<0.000000e+00> : vector<32xf32>
      %35 = vector.multi_reduction <add>, %34, %cst_24 [0] : vector<8x32xf32> to vector<32xf32>
      %36 = vector.shape_cast %35 : vector<32xf32> to vector<1x32xf32>
      %c0_25 = arith.constant 0 : index
      %c0_26 = arith.constant 0 : index
      %37 = vector.load %arg4[%c0_25, %c0_26] : memref<4x32xf32, #tpu.memory_space<vmem>>, vector<4x32xf32>
      %38 = vector.extract_strided_slice %37 {offsets = [0, 0], sizes = [1, 32], strides = [1, 1]} : vector<4x32xf32> to vector<1x32xf32>
      %cst_27 = arith.constant 1.600000e+01 : f32
      %39 = vector.broadcast %cst_27 : f32 to vector<1x32xf32>
      %40 = arith.mulf %38, %39 : vector<1x32xf32>
      %41 = vector.extract_strided_slice %37 {offsets = [1, 0], sizes = [1, 32], strides = [1, 1]} : vector<4x32xf32> to vector<1x32xf32>
      %42 = arith.mulf %41, %19 : vector<1x32xf32>
      %43 = arith.addf %40, %42 : vector<1x32xf32>
      %44 = vector.extract_strided_slice %37 {offsets = [2, 0], sizes = [1, 32], strides = [1, 1]} : vector<4x32xf32> to vector<1x32xf32>
      %45 = arith.mulf %44, %22 : vector<1x32xf32>
      %46 = arith.addf %43, %45 : vector<1x32xf32>
      %47 = vector.extract_strided_slice %37 {offsets = [3, 0], sizes = [1, 32], strides = [1, 1]} : vector<4x32xf32> to vector<1x32xf32>
      %48 = arith.mulf %47, %36 : vector<1x32xf32>
      %49 = arith.addf %46, %48 : vector<1x32xf32>
      %c0_28 = arith.constant 0 : index
      %c0_29 = arith.constant 0 : index
      %50 = vector.load %arg5[%c0_28, %c0_29] : memref<1x32xf32, #tpu.memory_space<vmem>>, vector<1x32xf32>
      tpu.vector_store %arg5[%c0_28, %c0_29], %49 {strides = array<i32>} : memref<1x32xf32, #tpu.memory_space<vmem>>, vector<1x32xf32>,
    } else {
    }
    return
  }
  func.func @transform_0(%arg0: i32, %arg1: i32) -> (i32, i32) {
    %c0_i32 = arith.constant 0 : i32
    return %arg1, %arg0 : i32, i32
  }
  func.func @transform_1(%arg0: i32, %arg1: i32) -> (i32, i32) {
    %c0_i32 = arith.constant 0 : i32
    %c0_i32_0 = arith.constant 0 : i32
    return %c0_i32, %arg0 : i32, i32
  }
  func.func @transform_2(%arg0: i32, %arg1: i32) -> (i32, i32) {
    %c0_i32 = arith.constant 0 : i32
    %c0_i32_0 = arith.constant 0 : i32
    return %c0_i32, %arg0 : i32, i32
  }
  func.func @transform_3(%arg0: i32, %arg1: i32) -> (i32, i32) {
    %c0_i32 = arith.constant 0 : i32
    %c0_i32_0 = arith.constant 0 : i32
    return %c0_i32, %arg0 : i32, i32
  }
}

</mosaic_0001>

<bundles_post_ra>
// kernel: tpu_custom_call.1
= control target key start
LH: loop header
LB: loop body
LE: loop exit
PB: predicated region body
PF: predicated region fallthrough
CT: control target
= control target key end

     0   :  { %8 = vsyncpa [#allocation6], 0  ;;  %s267_s0 = inlined_call_operand.hbm [shape: f32[16,32], index: 0, kind: input, shape index: {}]   ;;  %s268_s1 = inlined_call_operand.vmem [shape: f32[1,32], index: 1, kind: input, shape index: {}]   ;;  %s269_s2 = inlined_call_operand.hbm [shape: f32[4,32], index: 2, kind: input, shape index: {}]   ;;  %s270_s3 = inlined_call_operand.hbm [shape: f32[1,32], index: 3, kind: output, shape index: {}]  }
   0x1   :  { %9 = vsyncpa [#allocation9], 0 }
   0x2   :  { %10 = vsyncpa [#allocation7], 0  ;;  %s215_s12 = smov [#allocation5]  }
   0x3   :  { %s16_s13 = sshll.u32 %s215_s12, 4  ;;  %s17_s13 = int_to_ptr.vmem [resolvable:$true] %s16_s13 }
   0x4   :  { %s157_s14 = scalar_lea.vmem %s17_s13, 256  ;;  %p162_p1 = scmp.lt.s32.totalorder %s17_s13, %s17_s13 }
   0x5   :  { %p158_p0 = scmp.ne.s32.totalorder %s17_s13, %s157_s14  ;;  %p163_p2 = scmp.lt.s32.totalorder %s157_s14, %s157_s14 }
   0x7   :  { %p164_p3 = por %p163_p2, %p162_p1 }
   0x9   :  { %p165_p4 = pnand %p164_p3, %p158_p0 }
   0xb   :  { %168 = shalt.err (!%p165_p4)
}
   0xc   :  { %s216_s15 = smov 128   ;;  %s217_s16 = smov 8  }
   0xd   :  { %22 = dma.hbm_to_vmem [thread:$0]  %s267_s0, 256, %s17_s13, [#allocation6], %s216_s15, %s216_s15, %s217_s16  }
   0xe   :  { %s218_s19 = smov [#allocation8]  }
   0xf   :  { %s31_s20 = sshll.u32 %s218_s19, 4  ;;  %s32_s20 = int_to_ptr.vmem [resolvable:$true] %s31_s20 }
  0x10   :  { %s177_s21 = scalar_lea.vmem %s32_s20, 64  ;;  %p182_p6 = scmp.lt.s32.totalorder %s32_s20, %s32_s20 }
  0x11   :  { %p178_p5 = scmp.ne.s32.totalorder %s32_s20, %s177_s21  ;;  %p183_p7 = scmp.lt.s32.totalorder %s177_s21, %s177_s21 }
  0x13   :  { %p184_p8 = por %p183_p7, %p182_p6 }
  0x15   :  { %p185_p9 = pnand %p184_p8, %p178_p5 }
  0x17   :  { %188 = shalt.err (!%p185_p9)
}
  0x18   :  { %34 = dma.hbm_to_vmem [thread:$0]  %s269_s2, 64, %s32_s20, [#allocation9]  }
  0x19   :  { %209 = dma.done.wait [#allocation6], 256  }
  0x1a   :  { %210 = vsyncadd [#allocation6], 4294967040 }
  0x1b   :  { %211 = dma.done.wait [#allocation9], 64  }
  0x1c   :  { %212 = vsyncadd [#allocation9], 4294967232  ;;  %vm45_vm0 = vcmask 261120   ;;  %v219_v0 = vmov inf   ;;  %v220_v1 = vmov -inf   ;;  %v48_v2 = vld [vmem:[#allocation5] sm:$0xff]  ;;  %v88_v24 = vlaneseq }
  0x1d   :  { %46 = vst.msk [vmem:[#allocation3] sm:$0xff] %vm45_vm0, %v219_v0  ;;  %47 = vst.msk [vmem:[#allocation4] sm:$0xff] %vm45_vm0, %v220_v1  ;;  %v49_v3 = vld [vmem:[#allocation5 + $0x8] sm:$0xff]  ;;  %v52_v5 = vsel %vm45_vm0, %v48_v2, inf  ;;  %v58_v8 = vsel %vm45_vm0, %v48_v2, -inf  ;;  %vm124_vm1 = vcmask 253952  }
  0x1e   :  { %v53_v6 = vsel %vm45_vm0, %v49_v3, inf  ;;  %v59_v9 = vsel %vm45_vm0, %v49_v3, -inf  ;;  %v82_v25 = vld [vmem:[%s268_s1] sm:$0x1]  ;;  %v89_v31 = vshrl.u32 %v88_v24, 7  ;;  %s221_s1 = smov [#allocation10]  }
  0x1f   :  { %v54_v10 = vmin.f32 %v52_v5, %v53_v6  ;;  %v60_v11 = vmax.f32 %v58_v8, %v59_v9  ;;  %v84_v30 = vsub.f32 1.0, %v82_v25  ;;  %v107_v47 = vld [vmem:[#allocation8] sm:$0xf]  ;;  %s132_s24 = sshll.u32 %s221_s1, 4  ;;  %s133_s24 = int_to_ptr.vmem [resolvable:$true] %s132_s24 }
  0x20   :  { %v90_v36 = vsub.s32 0, %v89_v31  ;;  %v108_v53 = vmul.f32 16.0, %v107_v47  ;;  %s189_s25 = scalar_lea.vmem %s133_s24, 16  ;;  %s193_s26 = scalar_lea.vmem %s133_s24, 32 }
  0x21   :  { %p190_p10 = scmp.ne.s32.totalorder %s133_s24, %s189_s25  ;;  %p194_p11 = scmp.lt.s32.totalorder %s133_s24, %s133_s24 }
  0x22   :  { %p195_p12 = scmp.lt.s32.totalorder %s193_s26, %s189_s25 }
  0x24   :  { %v50_v4 = vld [vmem:[#allocation3] sm:$0xff]  ;;  %v57_v7 = vld [vmem:[#allocation4] sm:$0xff]  ;;  %p196_p13 = por %p195_p12, %p194_p11 }
  0x25   :  { %v55_v12 = vmin.f32 %v50_v4, %v54_v10  ;;  %v61_v13 = vmax.f32 %v57_v7, %v60_v11 }
  0x26   :  { %p197_p0 = pnand %p196_p13, %p190_p10 }
  0x27   :  { %56 = vst.msk [vmem:[#allocation3] sm:$0xff] %vm45_vm0, %v55_v12  ;;  %62 = vst.msk [vmem:[#allocation4] sm:$0xff] %vm45_vm0, %v61_v13 }
  0x2e   :  { %v66_v14 = vld [vmem:[#allocation3] sm:$0xff]  ;;  %v74_v15 = vld [vmem:[#allocation4] sm:$0xff] }
  0x2f   :  { %v67_v16 = vsel %vm45_vm0, %v66_v14, inf  ;;  %v75_v17 = vsel %vm45_vm0, %v74_v15, -inf }
  0x30   :  { %v68_v18 = vrot.slane %v67_v16, 4  ;;  %v76_v19 = vrot.slane %v75_v17, 4 }
  0x32   :  { %v69_v20 = vmin.f32 %v67_v16, %v68_v18  ;;  %v77_v21 = vmax.f32 %v75_v17, %v76_v19 }
  0x34   :  { %v70_v22 = vrot.slane %v69_v20, 2  ;;  %v78_v23 = vrot.slane %v77_v21, 2 }
  0x36   :  { %v71_v26 = vmin.f32 %v69_v20, %v70_v22  ;;  %v79_v27 = vmax.f32 %v77_v21, %v78_v23 }
  0x38   :  { %v72_v28 = vrot.slane %v71_v26, 1  ;;  %v80_v29 = vrot.slane %v79_v27, 1 }
  0x3a   :  { %v73_v32 = vmin.f32 %v71_v26, %v72_v28  ;;  %v81_v33 = vmax.f32 %v79_v27, %v80_v29 }
  0x3c   :  { %v83_v34 = vmul.f32 %v82_v25, %v81_v33  ;;  %v85_v35 = vmul.f32 %v84_v30, %v73_v32  ;;  %v109_v50 = vmul.f32 %v107_v47, %v73_v32  ;;  %v114_v56 = vmul.f32 %v107_v47, %v81_v33 }
  0x3e   :  { %v86_v37 = vadd.f32 %v85_v35, %v83_v34  ;;  %v111_v54 = vrot.slane %v109_v50, 1  ;;  %v116_v59 = vrot.slane %v114_v56, 2 }
  0x40   :  { %v91_v38 = vrot.slane %v86_v37, %v90_v36  ;;  %v113_v58 = vadd.f32 %v111_v54, %v108_v53 }
  0x42   :  { %v93_v39 = vsub.f32 %v48_v2, %v91_v38  ;;  %v94_v40 = vsub.f32 %v49_v3, %v91_v38  ;;  %v118_v61 = vadd.f32 %v116_v59, %v113_v58 }
  0x44   :  { %v95_v41 = vmax.f32 %v93_v39, 0.0  ;;  %v96_v42 = vmax.f32 %v94_v40, 0.0 }
  0x46   :  { %v97_v43 = vsel %vm45_vm0, %v95_v41, 0.0  ;;  %v98_v44 = vsel %vm45_vm0, %v96_v42, 0.0 }
  0x47   :  { %v99_v45 = vadd.f32 %v98_v44, %v97_v43 }
  0x49   :  { %v100_v46 = vsel %vm45_vm0, %v99_v45, 0.0 }
  0x4a   :  { %v101_v48 = vrot.slane %v100_v46, 4 }
  0x4c   :  { %v102_v49 = vadd.f32 %v101_v48, %v100_v46 }
  0x4e   :  { %v103_v51 = vrot.slane %v102_v49, 2 }
  0x50   :  { %v104_v52 = vadd.f32 %v103_v51, %v102_v49 }
  0x52   :  { %v105_v55 = vrot.slane %v104_v52, 1 }
  0x54   :  { %v106_v57 = vadd.f32 %v105_v55, %v104_v52 }
  0x56   :  { %v119_v60 = vmul.f32 %v107_v47, %v106_v57 }
  0x58   :  { %v121_v62 = vrot.slane %v119_v60, 3 }
  0x5a   :  { %v123_v63 = vadd.f32 %v121_v62, %v118_v61 }
  0x5c   :  { %125 = vst.msk [vmem:[#allocation10] sm:$0x1] %vm124_vm1, %v123_v63 }
  0x5d   :  { %200 = shalt.err (!%p197_p0)
}
  0x5e   :  { %135 = dma.vmem_to_hbm [thread:$0]  %s133_s24, 16, %s270_s3, [#allocation7]  }
  0x5f   :  { %213 = dma.done.wait [#allocation7], 16  }
  0x60   :  { %214 = vsyncadd [#allocation7], 4294967280 }
  0x61   :  { %139 = vsyncpa [#allocation6], 1 }
  0x62   :  { %140 = vsyncpa [#allocation9], 1 }
  0x63   :  { %141 = vsyncpa [#allocation7], 1 }

</bundles_post_ra>
